<compile_context>
chip_gen: v6e
topology: v6e:2x2x1
jax: 0.10.0
libtpu: 0.0.40
codegen_flags: <defaults>
</compile_context>

<pallas_src>
import functools
import math

import jax
import jax.numpy as jnp
import numpy as np
from jax.experimental import pallas as pl
from jax.experimental.pallas import tpu as pltpu

LANE = 128
MIN_PALLAS_ELEMS = 1 << 16          # below this a fused XLA elementwise op wins
TWO_PI = 2.0 * math.pi
INV_TWO_PI = 1.0 / TWO_PI


def _round_up(a: int, b: int) -> int:
    return (a + b - 1) // b * b


@functools.lru_cache(maxsize=None)
def _hw_defaults():
    """Returns (block_rows_cap, vmem_limit_bytes_or_None, two_step_row_threshold)."""
    try:
        kind = jax.devices()[0].device_kind.lower().replace(" ", "")
    except Exception:  # pragma: no cover - defensive fallback
        kind = ""
    if "v5" in kind:
        # v5e: ~0.82 TB/s HBM -> 2 MiB blocks already amortize the ~0.35us step
        # overhead; keep 2*in + 2*out buffers (8 MiB) under the 16 MiB default
        # scoped-VMEM limit (no explicit raise needed).
        return 4096, None, 1024
    if "v6" in kind:
        # v6e: 4 MiB blocks; raise the scoped-VMEM limit for pipeline headroom.
        return 8192, 48 << 20, 1024
    if "7" in kind:
        # v7x: 3.2 TB/s HBM -> 8 MiB blocks to amortize step cost (needs an
        # explicit vmem_limit above the 32 MiB default; 64 MiB physical), and
        # split into >=2 "parallel" steps earlier so both TensorCores get work.
        return 16384, 48 << 20, 512
    return 8192, 48 << 20, 1024


def _phase_quantize_math(x, gamma, v_bit, v_max):
    """Shared elementwise math (f32 in / f32 out). Used by the Pallas kernel
    body, the small-tensor / tail fast path and the self-test reference."""
    if v_bit >= 16:
        # gamma_noise_std == 0  =>  gamma/self.gamma == 1, so the torch
        # expression `1.0 * (x % 2pi) % 2pi` reduces to a single mod,
        # rewritten here with a precomputed reciprocal.
        return x - jnp.floor(x * INV_TWO_PI) * TWO_PI

    inv_gamma = 1.0 / gamma
    levels = float(2 ** v_bit - 1)
    scale = levels / v_max            # replaces x / v_max * levels
    inv_scale = v_max / levels        # replaces ... / levels * v_max
    v_2pi = math.sqrt(TWO_PI / gamma)

    # phase_to_voltage: sqrt((x mod 2pi) / gamma); mod rewritten with a
    # precomputed reciprocal (XLA's float-mod lowering hides a full divide).
    r = x - jnp.floor(x * INV_TWO_PI) * TWO_PI            # in [0, 2pi) (+-1 ulp)
    t = r * inv_gamma
    # sqrt(t) as t * rsqrt(t): rsqrt issues on the EUP slot (otherwise idle
    # here), freeing VALU ops; the where guards t == 0 (and a -1ulp negative r).
    v = jnp.where(t > 0.0, t * jax.lax.rsqrt(t), 0.0)
    # voltage_quantize_fn / uniform_quantize (2 <= v_bit <= 15 here)
    vq = jnp.round(v * scale) * inv_scale
    # clip_to_valid_quantized_voltage, wrap_around=True: keep where vq < v_2pi
    vq = jnp.where(vq < v_2pi, vq, 0.0)
    # voltage_to_phase. After the clip, gamma*vq^2 < 2pi (up to 1 ulp), so the
    # torch mod is redundant; the single wrap below also maps a 2pi+eps
    # rounding overflow to eps, exactly as mod-then-wrap would.
    p = gamma * vq * vq
    p = jnp.where(p > math.pi, p - TWO_PI, p)
    return p


def _phase_quantize_kernel(x_ref, o_ref, *, gamma, v_bit, v_max):
    # Cast up in-register; keep HBM traffic in the original dtype.
    x = x_ref[...].astype(jnp.float32)
    o_ref[...] = _phase_quantize_math(x, gamma, v_bit, v_max).astype(o_ref.dtype)


def _pallas_run(flat_aligned, rows, out_dtype, gamma, v_bit, v_max):
    """Run the elementwise kernel on a lane-aligned flat array (rows*LANE elems)."""
    block_rows_cap, vmem_limit, two_step_rows = _hw_defaults()

    if rows <= two_step_rows:
        block_rows = rows                       # single full-extent block
    else:
        # Big lane-dense slabs for HBM roofline; keep >= 2 grid steps so both
        # v7x TensorCores are used on medium/large inputs.
        block_rows = min(block_rows_cap, _round_up(pl.cdiv(rows, 2), 8))
    grid = (pl.cdiv(rows, block_rows),)         # partial last block handled by Pallas

    kernel = functools.partial(_phase_quantize_kernel,
                               gamma=gamma, v_bit=v_bit, v_max=v_max)

    x2d = flat_aligned.reshape(rows, LANE)
    out2d = pl.pallas_call(
        kernel,
        out_shape=jax.ShapeDtypeStruct((rows, LANE), out_dtype),
        grid=grid,
        in_specs=[pl.BlockSpec((block_rows, LANE), lambda i: (i, 0))],
        out_specs=pl.BlockSpec((block_rows, LANE), lambda i: (i, 0)),
        compiler_params=pltpu.CompilerParams(
            dimension_semantics=("parallel",),
            vmem_limit_bytes=vmem_limit),
    )(x2d)
    return out2d.reshape(-1)


def phase_quantize(x, *, v_bit=8, v_pi=4.36, v_max=10.8,
                   gamma_noise_std=0.0, crosstalk_factor=0.0,
                   use_pallas=None):
    """JAX/Pallas wrapper reproducing phase_quantize_fn(v_bit, v_pi, v_max)(x)."""
    # TODO(synk): v_bit == 1 (sign-quant) branch needs a global mean(|v|)
    # reduction (two-pass); not implemented.
    assert 0 < v_bit <= 32 and v_bit != 1, "v_bit==1 path not implemented"
    # TODO(synk): gamma noise injection (gen_gaussian_noise) not implemented;
    # default gamma_noise_std=0 means gamma == pi / v_pi**2 exactly.
    assert gamma_noise_std <= 1e-5
    # TODO(synk): ThermalCrosstalkSimulator.simple_simulate (conv2d crosstalk)
    # not implemented; default crosstalk_factor=0 means it is never executed.
    assert crosstalk_factor <= 1e-5

    gamma = math.pi / (v_pi ** 2)
    orig_shape = x.shape
    orig_dtype = x.dtype
    n = int(np.prod(orig_shape)) if orig_shape else 1

    if use_pallas is None:
        use_pallas = n >= MIN_PALLAS_ELEMS
    if not use_pallas or n < LANE:
        # Tiny tensors: a fused XLA elementwise op beats pallas_call overhead.
        return _phase_quantize_math(x.astype(jnp.float32),
                                    gamma, v_bit, v_max).astype(orig_dtype)

    flat = x.reshape(-1)                        # free bitcast; original dtype in HBM
    n_main = (n // LANE) * LANE
    rows = n_main // LANE

    if n_main == n:
        # Lane-aligned: zero extra HBM passes (reshapes are free).
        out_flat = _pallas_run(flat, rows, orig_dtype, gamma, v_bit, v_max)
    else:
        # Misaligned: stream the lane-aligned prefix through Pallas and handle
        # the <=127-element tail with the fused pure-JAX path (no padded copy
        # of the full tensor, no full-tensor tail slice).
        main = _pallas_run(flat[:n_main], rows, orig_dtype, gamma, v_bit, v_max)
        tail = _phase_quantize_math(flat[n_main:].astype(jnp.float32),
                                    gamma, v_bit, v_max).astype(orig_dtype)
        out_flat = jnp.concatenate([main, tail])

    return out_flat.reshape(orig_shape)


if __name__ == "__main__":
    key = jax.random.PRNGKey(0)
    k1, k2, k3 = jax.random.split(key, 3)

    v_bit, v_pi, v_max = 8, 4.36, 10.8
    gamma = math.pi / (v_pi ** 2)

    def check(x, forced):
        out = phase_quantize(x, v_bit=v_bit, v_pi=v_pi, v_max=v_max,
                             use_pallas=forced)
        out = np.asarray(jax.block_until_ready(out)).astype(np.float32).ravel()
        ref = np.asarray(_phase_quantize_math(x.astype(jnp.float32),
                                              gamma, v_bit, v_max)).ravel()
        diff = np.abs(out - ref)
        bad = diff > 1e-4
        # Tolerate (extremely rare) single-quantization-level hops caused by
        # <=1-ulp XLA-vs-Mosaic rsqrt differences when a value sits exactly on
        # a rounding boundary; everything else must match tightly.
        assert bad.mean() < 1e-3, f"too many mismatches: {int(bad.sum())}/{bad.size}"
        assert float(diff.max()) < 0.15, f"max diff {float(diff.max())}"

    # 1) Small NCHW-like MZI phase block, forced through the Pallas path.
    x_small = jax.random.uniform(k1, (2, 4, 16, 16), dtype=jnp.float32,
                                 minval=-2.0 * math.pi, maxval=2.0 * math.pi)
    check(x_small, forced=True)

    # 2) Non-lane-aligned size: exercises the aligned-prefix + pure-JAX-tail path.
    x_odd = jax.random.uniform(k2, (3, 7, 11, 13), dtype=jnp.float32,
                               minval=-2.0 * math.pi, maxval=2.0 * math.pi)
    check(x_odd, forced=True)

    # 3) Medium size: multi-step parallel grid with a partial last block
    #    (auto-dispatch picks the Pallas path).
    x_med = jax.random.uniform(k3, (8, 257, 129), dtype=jnp.float32,
                               minval=-2.0 * math.pi, maxval=2.0 * math.pi)
    check(x_med, forced=None)

    print("KERNEL_OK")
</pallas_src>

<mosaic_0001>
module attributes {stable_mosaic.version = 11 : i64} {
  func.func @_phase_quantize_kernel(%arg0: i32, %arg1: memref<16x128xf32, #tpu.memory_space<vmem>>, %arg2: memref<16x128xf32, #tpu.memory_space<vmem>>) attributes {dimension_semantics = [#tpu.dimension_semantics<parallel>], iteration_bounds = array<i64: 1>, scalar_prefetch = 0 : i64, scratch_operands = 0 : i64, tpu.core_type = #tpu.core_type<tc>, window_params = [{transform_indices = @transform_0, window_bounds = array<i64: 16, 128>}, {transform_indices = @transform_1, window_bounds = array<i64: 16, 128>}]} {
    %c0 = arith.constant 0 : index
    %c0_0 = arith.constant 0 : index
    %0 = vector.load %arg1[%c0, %c0_0] : memref<16x128xf32, #tpu.memory_space<vmem>>, vector<16x128xf32>
    %cst = arith.constant 0.159154937 : f32
    %1 = vector.broadcast %cst : f32 to vector<16x128xf32>
    %2 = arith.mulf %0, %1 : vector<16x128xf32>
    %3 = math.floor %2 : vector<16x128xf32>
    %cst_1 = arith.constant 6.28318548 : f32
    %4 = vector.broadcast %cst_1 : f32 to vector<16x128xf32>
    %5 = arith.mulf %3, %4 : vector<16x128xf32>
    %6 = arith.subf %0, %5 : vector<16x128xf32>
    %cst_2 = arith.constant 6.05094337 : f32
    %7 = vector.broadcast %cst_2 : f32 to vector<16x128xf32>
    %8 = arith.mulf %6, %7 : vector<16x128xf32>
    %cst_3 = arith.constant 0.000000e+00 : f32
    %9 = vector.broadcast %cst_3 : f32 to vector<16x128xf32>
    %10 = arith.cmpf ogt, %8, %9 : vector<16x128xf32>
    %11 = math.rsqrt %8 : vector<16x128xf32>
    %12 = arith.mulf %8, %11 : vector<16x128xf32>
    %cst_4 = arith.constant 0.000000e+00 : f32
    %13 = vector.broadcast %cst_4 : f32 to vector<16x128xf32>
    %14 = arith.select %10, %12, %13 : vector<16x128xi1>, vector<16x128xf32>
    %cst_5 = arith.constant 23.6111107 : f32
    %15 = vector.broadcast %cst_5 : f32 to vector<16x128xf32>
    %16 = arith.mulf %14, %15 : vector<16x128xf32>
    %17 = math.roundeven %16 : vector<16x128xf32>
    %cst_6 = arith.constant 0.0423529409 : f32
    %18 = vector.broadcast %cst_6 : f32 to vector<16x128xf32>
    %19 = arith.mulf %17, %18 : vector<16x128xf32>
    %cst_7 = arith.constant 6.16597128 : f32
    %20 = vector.broadcast %cst_7 : f32 to vector<16x128xf32>
    %21 = arith.cmpf olt, %19, %20 : vector<16x128xf32>
    %cst_8 = arith.constant 0.000000e+00 : f32
    %22 = vector.broadcast %cst_8 : f32 to vector<16x128xf32>
    %23 = arith.select %21, %19, %22 : vector<16x128xi1>, vector<16x128xf32>
    %cst_9 = arith.constant 0.165263474 : f32
    %24 = vector.broadcast %cst_9 : f32 to vector<16x128xf32>
    %25 = arith.mulf %24, %23 : vector<16x128xf32>
    %26 = arith.mulf %25, %23 : vector<16x128xf32>
    %cst_10 = arith.constant 3.14159274 : f32
    %27 = vector.broadcast %cst_10 : f32 to vector<16x128xf32>
    %28 = arith.cmpf ogt, %26, %27 : vector<16x128xf32>
    %cst_11 = arith.constant 6.28318548 : f32
    %29 = vector.broadcast %cst_11 : f32 to vector<16x128xf32>
    %30 = arith.subf %26, %29 : vector<16x128xf32>
    %31 = arith.select %28, %30, %26 : vector<16x128xi1>, vector<16x128xf32>
    %c0_12 = arith.constant 0 : index
    %c0_13 = arith.constant 0 : index
    %32 = vector.load %arg2[%c0_12, %c0_13] : memref<16x128xf32, #tpu.memory_space<vmem>>, vector<16x128xf32>
    tpu.vector_store %arg2[%c0_12, %c0_13], %31 {strides = array<i32>} : memref<16x128xf32, #tpu.memory_space<vmem>>, vector<16x128xf32>,
    return
  }
  func.func @transform_0(%arg0: i32) -> (i32, i32) {
    %c0_i32 = arith.constant 0 : i32
    %c0_i32_0 = arith.constant 0 : i32
    return %arg0, %c0_i32 : i32, i32
  }
  func.func @transform_1(%arg0: i32) -> (i32, i32) {
    %c0_i32 = arith.constant 0 : i32
    %c0_i32_0 = arith.constant 0 : i32
    return %arg0, %c0_i32 : i32, i32
  }
}

</mosaic_0001>

<bundles_post_ra>
// kernel: tpu_custom_call.1
= control target key start
LH: loop header
LB: loop body
LE: loop exit
PB: predicated region body
PF: predicated region fallthrough
CT: control target
= control target key end

     0   :  { %6 = vsyncpa [#allocation3], 0  ;;  %s178_s0 = inlined_call_operand.hbm [shape: f32[16,128], index: 0, kind: input, shape index: {}]   ;;  %s179_s1 = inlined_call_operand.hbm [shape: f32[16,128], index: 1, kind: output, shape index: {}]  }
   0x1   :  { %7 = vsyncpa [#allocation4], 0  ;;  %s152_s6 = smov [#allocation2]  }
   0x2   :  { %s13_s7 = sshll.u32 %s152_s6, 4  ;;  %s14_s7 = int_to_ptr.vmem [resolvable:$true] %s13_s7 }
   0x3   :  { %s116_s8 = scalar_lea.vmem %s14_s7, 256  ;;  %p121_p1 = scmp.lt.s32.totalorder %s14_s7, %s14_s7 }
   0x4   :  { %p117_p0 = scmp.ne.s32.totalorder %s14_s7, %s116_s8  ;;  %p122_p2 = scmp.lt.s32.totalorder %s116_s8, %s116_s8 }
   0x6   :  { %p123_p3 = por %p122_p2, %p121_p1 }
   0x8   :  { %p124_p4 = pnand %p123_p3, %p117_p0 }
   0xa   :  { %127 = shalt.err (!%p124_p4)
}
   0xb   :  { %s153_s9 = smov 128   ;;  %s154_s10 = smov 8  }
   0xc   :  { %19 = dma.hbm_to_vmem [thread:$0]  %s178_s0, 256, %s14_s7, [#allocation3], %s153_s9, %s153_s9, %s154_s10  }
   0xd   :  { %148 = dma.done.wait [#allocation3], 256  }
   0xe   :  { %149 = vsyncadd [#allocation3], 4294967040  ;;  %v23_v0 = vld [vmem:[#allocation2] sm:$0xff]  ;;  %v24_v1 = vld [vmem:[#allocation2 + $0x8] sm:$0xff]  ;;  %s155_s0 = smov [#allocation5]  }
   0xf   :  { %v25_v2 = vmul.f32 0.15915494, %v23_v0  ;;  %v26_v3 = vmul.f32 0.15915494, %v24_v1  ;;  %s70_s13 = sshll.u32 %s155_s0, 4  ;;  %s71_s13 = int_to_ptr.vmem [resolvable:$true] %s70_s13 }
  0x10   :  { %s128_s14 = scalar_lea.vmem %s71_s13, 256  ;;  %p133_p6 = scmp.lt.s32.totalorder %s71_s13, %s71_s13 }
  0x11   :  { %v27_v4 = vfloor.f32 %v25_v2  ;;  %v28_v5 = vfloor.f32 %v26_v3  ;;  %p129_p5 = scmp.ne.s32.totalorder %s71_s13, %s128_s14  ;;  %p134_p7 = scmp.lt.s32.totalorder %s128_s14, %s128_s14 }
  0x13   :  { %v29_v6 = vmul.f32 6.2831855, %v27_v4  ;;  %v30_v7 = vmul.f32 6.2831855, %v28_v5  ;;  %p135_p8 = por %p134_p7, %p133_p6 }
  0x15   :  { %v31_v8 = vsub.f32 %v23_v0, %v29_v6  ;;  %v32_v9 = vsub.f32 %v24_v1, %v30_v7  ;;  %p136_p9 = pnand %p135_p8, %p129_p5 }
  0x17   :  { %v33_v10 = vmul.f32 6.0509434, %v31_v8  ;;  %v34_v11 = vmul.f32 6.0509434, %v32_v9 }
  0x19   :  { %104 = vrsqrt.f32 %v33_v10  ;;  %vm35_vm0 = vcmp.gt.f32.partialorder %v33_v10, 0.0  ;;  %vm36_vm1 = vcmp.gt.f32.partialorder %v34_v11, 0.0 }
  0x1a   :  { %106 = vrsqrt.f32 %v34_v11 }
  0x26   :  { %v105_v12 = vpop.eup %104 }
  0x27   :  { %v107_v13 = vpop.eup %106  ;;  %v39_v14 = vmul.f32 %v105_v12, %v33_v10 }
  0x28   :  { %v40_v15 = vmul.f32 %v107_v13, %v34_v11 }
  0x29   :  { %v41_v16 = vsel %vm35_vm0, %v39_v14, 0.0 }
  0x2a   :  { %v43_v17 = vmul.f32 23.61111, %v41_v16  ;;  %v42_v18 = vsel %vm36_vm1, %v40_v15, 0.0 }
  0x2b   :  { %v44_v19 = vmul.f32 23.61111, %v42_v18 }
  0x2c   :  { %v86_v20 = vcvt.f32.s32 %v43_v17  ;;  %v84_v21 = vand.u32 2147483647, %v43_v17  ;;  %v89_v24 = vand.u32 2147483648, %v43_v17 }
  0x2d   :  { %v94_v22 = vcvt.f32.s32 %v44_v19  ;;  %v92_v25 = vand.u32 2147483647, %v44_v19  ;;  %v97_v27 = vand.u32 2147483648, %v44_v19 }
  0x2e   :  { %v87_v23 = vcvt.s32.f32 %v86_v20  ;;  %vm85_vm2 = vcmp.lt.f32.partialorder %v84_v21, 8388608.0 }
  0x2f   :  { %v95_v26 = vcvt.s32.f32 %v94_v22  ;;  %vm93_vm3 = vcmp.lt.f32.partialorder %v92_v25, 8388608.0 }
  0x30   :  { %v88_v28 = vand.u32 2147483647, %v87_v23 }
  0x31   :  { %v96_v29 = vand.u32 2147483647, %v95_v26 }
  0x32   :  { %v90_v30 = vor.u32 %v89_v24, %v88_v28 }
  0x33   :  { %v98_v31 = vor.u32 %v97_v27, %v96_v29 }
  0x34   :  { %v91_v32 = vsel %vm85_vm2, %v90_v30, %v43_v17 }
  0x35   :  { %v47_v33 = vmul.f32 0.04235294, %v91_v32  ;;  %v99_v34 = vsel %vm93_vm3, %v98_v31, %v44_v19 }
  0x36   :  { %v48_v35 = vmul.f32 0.04235294, %v99_v34 }
  0x37   :  { %vm49_vm4 = vcmp.lt.f32.partialorder %v47_v33, 6.1659713 }
  0x38   :  { %v51_v36 = vsel %vm49_vm4, %v47_v33, 0.0  ;;  %vm50_vm5 = vcmp.lt.f32.partialorder %v48_v35, 6.1659713 }
  0x39   :  { %v53_v37 = vmul.f32 0.16526347, %v51_v36  ;;  %v52_v38 = vsel %vm50_vm5, %v48_v35, 0.0 }
  0x3a   :  { %v54_v39 = vmul.f32 0.16526347, %v52_v38 }
  0x3b   :  { %v55_v40 = vmul.f32 %v53_v37, %v51_v36 }
  0x3c   :  { %v56_v41 = vmul.f32 %v54_v39, %v52_v38 }
  0x3d   :  { %vm57_vm6 = vcmp.gt.f32.partialorder %v55_v40, 3.1415927  ;;  %v82_v42 = vadd.f32 -6.2831855, %v55_v40 }
  0x3e   :  { %vm58_vm7 = vcmp.gt.f32.partialorder %v56_v41, 3.1415927  ;;  %v83_v43 = vadd.f32 -6.2831855, %v56_v41 }
  0x3f   :  { %v61_v44 = vsel %vm57_vm6, %v82_v42, %v55_v40 }
  0x40   :  { %63 = vst [vmem:[#allocation5] sm:$0xff] %v61_v44  ;;  %v62_v45 = vsel %vm58_vm7, %v83_v43, %v56_v41 }
  0x41   :  { %64 = vst [vmem:[#allocation5 + $0x8] sm:$0xff] %v62_v45 }
  0x42   :  { %139 = shalt.err (!%p136_p9)
}
  0x43   :  { %76 = dma.vmem_to_hbm [thread:$0]  %s71_s13, 256, %s179_s1, [#allocation4], %s153_s9, %s153_s9, %s154_s10  }
  0x44   :  { %150 = dma.done.wait [#allocation4], 256  }
  0x45   :  { %151 = vsyncadd [#allocation4], 4294967040 }
  0x46   :  { %80 = vsyncpa [#allocation3], 1 }
  0x47   :  { %81 = vsyncpa [#allocation4], 1 }

</bundles_post_ra>
